<compile_context>
chip_gen: v6e
topology: v6e:2x2x1
jax: 0.10.0
libtpu: 0.0.40
codegen_flags: <defaults>
</compile_context>

<pallas_src>
import math
import jax
import jax.numpy as jnp
from jax.experimental import pallas as pl
from jax.experimental.pallas import tpu as pltpu

NEG_SLOPE = 0.01  # torch.nn.LeakyReLU default


def _leaky_relu(x):
    # For 0 < slope < 1: max(x, slope*x) == leaky_relu(x).  2 VPU ops.
    return jnp.maximum(x, NEG_SLOPE * x)


def mlp_kernel(x_ref,
               w1_ref, b1_ref,
               w2_ref, b2_ref,
               w3_ref, b3_ref,
               w4_ref, b4_ref,
               o_ref):
    # Layer 1 fully in f32: K = D_in is tiny, so MXU cost is negligible and we
    # avoid any wrapper-side cast / extra HBM traffic on the input stream.
    x = x_ref[...]
    h = jnp.dot(x, w1_ref[...], preferred_element_type=jnp.float32) + b1_ref[...]
    h = _leaky_relu(h)

    # Layers 2-4: bf16 x bf16 -> f32 on the MXU; bias add + LeakyReLU in f32
    # (safe on v5e's VPU; v6e/v7x could run these packed bf16 for ~2x VPU).
    h = jnp.dot(h.astype(jnp.bfloat16), w2_ref[...],
                preferred_element_type=jnp.float32) + b2_ref[...]
    h = _leaky_relu(h)

    h = jnp.dot(h.astype(jnp.bfloat16), w3_ref[...],
                preferred_element_type=jnp.float32) + b3_ref[...]
    h = _leaky_relu(h)

    # Dropout(0.1): identity in eval mode.
    # TODO(synk): training-mode dropout (pltpu.prng_seed + prng_random_bits mask)
    # not emitted here.

    out = jnp.dot(h.astype(jnp.bfloat16), w4_ref[...],
                  preferred_element_type=jnp.float32) + b4_ref[...]
    o_ref[...] = out.astype(o_ref.dtype)


def prepare_params(params):
    """One-time param prep (hoisted out of the per-call hot path):
    layer-1 weights stay f32, layers 2-4 are cast to bf16 for the MXU."""
    return {
        "w1": params["w1"].astype(jnp.float32),
        "w2": params["w2"].astype(jnp.bfloat16),
        "w3": params["w3"].astype(jnp.bfloat16),
        "w4": params["w4"].astype(jnp.bfloat16),
        "b1": params["b1"].astype(jnp.float32),
        "b2": params["b2"].astype(jnp.float32),
        "b3": params["b3"].astype(jnp.float32),
        "b4": params["b4"].astype(jnp.float32),
    }


def downstream_task_forward(x, prepped, *, tile_b=1024):
    """x: (B, D_in) float32. prepped: output of prepare_params()."""
    B, D_in = x.shape
    D_out = prepped["w4"].shape[1]

    # Batch tile: single tile for small batches; for large batches cap the tile
    # so n_tiles >= 2 (lets the "parallel" grid axis split across v7x's 2 TCs).
    if B <= tile_b:
        tb = max(8, ((B + 7) // 8) * 8)
    else:
        tb = min(tile_b, ((pl.cdiv(B, 2) + 7) // 8) * 8)
    n_tiles = pl.cdiv(B, tb)
    B_pad = n_tiles * tb

    x_in = x
    if B_pad != B:
        x_in = jnp.pad(x_in, ((0, B_pad - B), (0, 0)))

    w1, w2, w3, w4 = prepped["w1"], prepped["w2"], prepped["w3"], prepped["w4"]
    b1, b2, b3, b4 = prepped["b1"], prepped["b2"], prepped["b3"], prepped["b4"]

    # Weights / biases stay VMEM-resident across batch tiles (constant index_map).
    resident = lambda a: pl.BlockSpec(a.shape, lambda i: (0, 0))

    flops = 2 * B_pad * (D_in * 64 + 64 * 128 + 128 * 256 + 256 * D_out)
    bytes_accessed = (
        int(x_in.size) * 4 + B_pad * D_out * 4
        + int(w1.size) * 4 + sum(int(w.size) * 2 for w in (w2, w3, w4))
        + sum(int(b.size) * 4 for b in (b1, b2, b3, b4)))

    out = pl.pallas_call(
        mlp_kernel,
        out_shape=jax.ShapeDtypeStruct((B_pad, D_out), jnp.float32),
        grid=(n_tiles,),
        in_specs=[pl.BlockSpec((tb, D_in), lambda i: (i, 0)),
                  resident(w1), resident(b1),
                  resident(w2), resident(b2),
                  resident(w3), resident(b3),
                  resident(w4), resident(b4)],
        out_specs=pl.BlockSpec((tb, D_out), lambda i: (i, 0)),
        compiler_params=pltpu.CompilerParams(
            dimension_semantics=("parallel",)),
        cost_estimate=pl.CostEstimate(flops=flops, transcendentals=0,
                                      bytes_accessed=bytes_accessed),
    )(x_in, w1, b1, w2, b2, w3, b3, w4, b4)

    return out[:B, :]


def init_params(key, d_in, d_out):
    """Deterministic init mirroring PyTorch Linear default (uniform +/-1/sqrt(fan_in)).
    Weights are stored pre-transposed as (in, out)."""
    dims = [(d_in, 64), (64, 128), (128, 256), (256, d_out)]
    params = {}
    for i, (fi, fo) in enumerate(dims, start=1):
        key, kw, kb = jax.random.split(key, 3)
        bound = 1.0 / math.sqrt(fi)
        params[f"w{i}"] = jax.random.uniform(kw, (fi, fo), jnp.float32, -bound, bound)
        params[f"b{i}"] = jax.random.uniform(kb, (1, fo), jnp.float32, -bound, bound)
    return params


def reference_forward(x, params):
    h = x
    for i in (1, 2, 3):
        h = jnp.where(h @ params[f"w{i}"] + params[f"b{i}"] >= 0,
                      h @ params[f"w{i}"] + params[f"b{i}"],
                      NEG_SLOPE * (h @ params[f"w{i}"] + params[f"b{i}"]))
    return h @ params["w4"] + params["b4"]


if __name__ == "__main__":
    B, D_IN, D_OUT = 8, 32, 8  # small shapes consistent with the module

    key = jax.random.PRNGKey(0)
    kx, kp = jax.random.split(key)
    x = jax.random.normal(kx, (B, D_IN), dtype=jnp.float32)
    params = init_params(kp, D_IN, D_OUT)
    prepped = prepare_params(params)

    out = downstream_task_forward(x, prepped)
    out = jax.block_until_ready(out)

    ref = reference_forward(x, params)
    assert out.shape == (B, D_OUT)
    # Layers 2-4 feed the MXU in bf16 with f32 accumulation: relaxed tolerance.
    assert jnp.allclose(out, ref, atol=2e-2, rtol=2e-2), "mismatch vs reference"

    print("KERNEL_OK")
</pallas_src>

<mosaic_0001>
module attributes {stable_mosaic.version = 11 : i64} {
  func.func @mlp_kernel(%arg0: i32, %arg1: memref<8x32xf32, #tpu.memory_space<vmem>>, %arg2: memref<32x64xf32, #tpu.memory_space<vmem>>, %arg3: memref<1x64xf32, #tpu.memory_space<vmem>>, %arg4: memref<64x128xbf16, #tpu.memory_space<vmem>>, %arg5: memref<1x128xf32, #tpu.memory_space<vmem>>, %arg6: memref<128x256xbf16, #tpu.memory_space<vmem>>, %arg7: memref<1x256xf32, #tpu.memory_space<vmem>>, %arg8: memref<256x8xbf16, #tpu.memory_space<vmem>>, %arg9: memref<1x8xf32, #tpu.memory_space<vmem>>, %arg10: memref<8x8xf32, #tpu.memory_space<vmem>>) attributes {dimension_semantics = [#tpu.dimension_semantics<parallel>], iteration_bounds = array<i64: 1>, scalar_prefetch = 0 : i64, scratch_operands = 0 : i64, tpu.core_type = #tpu.core_type<tc>, window_params = [{transform_indices = @transform_0, window_bounds = array<i64: 8, 32>}, {pipeline_mode = #tpu.pipeline_mode<synchronous>, transform_indices = @transform_1, window_bounds = array<i64: 32, 64>}, {pipeline_mode = #tpu.pipeline_mode<synchronous>, transform_indices = @transform_2, window_bounds = array<i64: 1, 64>}, {pipeline_mode = #tpu.pipeline_mode<synchronous>, transform_indices = @transform_3, window_bounds = array<i64: 64, 128>}, {pipeline_mode = #tpu.pipeline_mode<synchronous>, transform_indices = @transform_4, window_bounds = array<i64: 1, 128>}, {pipeline_mode = #tpu.pipeline_mode<synchronous>, transform_indices = @transform_5, window_bounds = array<i64: 128, 256>}, {pipeline_mode = #tpu.pipeline_mode<synchronous>, transform_indices = @transform_6, window_bounds = array<i64: 1, 256>}, {pipeline_mode = #tpu.pipeline_mode<synchronous>, transform_indices = @transform_7, window_bounds = array<i64: 256, 8>}, {pipeline_mode = #tpu.pipeline_mode<synchronous>, transform_indices = @transform_8, window_bounds = array<i64: 1, 8>}, {transform_indices = @transform_9, window_bounds = array<i64: 8, 8>}]} {
    %c0 = arith.constant 0 : index
    %c0_0 = arith.constant 0 : index
    %0 = vector.load %arg1[%c0, %c0_0] : memref<8x32xf32, #tpu.memory_space<vmem>>, vector<8x32xf32>
    %c0_1 = arith.constant 0 : index
    %c0_2 = arith.constant 0 : index
    %1 = vector.load %arg2[%c0_1, %c0_2] : memref<32x64xf32, #tpu.memory_space<vmem>>, vector<32x64xf32>
    %cst = arith.constant dense<0.000000e+00> : vector<8x64xf32>
    %2 = tpu.matmul %0, %1, %cst {dimension_numbers = #tpu.dot_dimension_numbers<[1], [0], [0], [1], [0, 0, 1, 1], [], []>} : vector<8x32xf32>, vector<32x64xf32>, vector<8x64xf32> -> vector<8x64xf32>
    %c0_3 = arith.constant 0 : index
    %c0_4 = arith.constant 0 : index
    %3 = vector.load %arg3[%c0_3, %c0_4] : memref<1x64xf32, #tpu.memory_space<vmem>>, vector<1x64xf32>
    %4 = vector.broadcast %3 : vector<1x64xf32> to vector<8x64xf32>
    %5 = arith.addf %2, %4 : vector<8x64xf32>
    %cst_5 = arith.constant 0.00999999977 : f32
    %6 = vector.broadcast %cst_5 : f32 to vector<8x64xf32>
    %7 = arith.mulf %6, %5 : vector<8x64xf32>
    %8 = arith.maximumf %5, %7 : vector<8x64xf32>
    %9 = arith.truncf %8 : vector<8x64xf32> to vector<8x64xbf16>
    %c0_6 = arith.constant 0 : index
    %c0_7 = arith.constant 0 : index
    %10 = vector.load %arg4[%c0_6, %c0_7] : memref<64x128xbf16, #tpu.memory_space<vmem>>, vector<64x128xbf16>
    %cst_8 = arith.constant dense<0.000000e+00> : vector<8x128xf32>
    %11 = tpu.matmul %9, %10, %cst_8 {dimension_numbers = #tpu.dot_dimension_numbers<[1], [0], [0], [1], [0, 0, 1, 1], [], []>} : vector<8x64xbf16>, vector<64x128xbf16>, vector<8x128xf32> -> vector<8x128xf32>
    %c0_9 = arith.constant 0 : index
    %c0_10 = arith.constant 0 : index
    %12 = vector.load %arg5[%c0_9, %c0_10] : memref<1x128xf32, #tpu.memory_space<vmem>>, vector<1x128xf32>
    %13 = vector.broadcast %12 : vector<1x128xf32> to vector<8x128xf32>
    %14 = arith.addf %11, %13 : vector<8x128xf32>
    %cst_11 = arith.constant 0.00999999977 : f32
    %15 = vector.broadcast %cst_11 : f32 to vector<8x128xf32>
    %16 = arith.mulf %15, %14 : vector<8x128xf32>
    %17 = arith.maximumf %14, %16 : vector<8x128xf32>
    %18 = arith.truncf %17 : vector<8x128xf32> to vector<8x128xbf16>
    %c0_12 = arith.constant 0 : index
    %c0_13 = arith.constant 0 : index
    %19 = vector.load %arg6[%c0_12, %c0_13] : memref<128x256xbf16, #tpu.memory_space<vmem>>, vector<128x256xbf16>
    %cst_14 = arith.constant dense<0.000000e+00> : vector<8x256xf32>
    %20 = tpu.matmul %18, %19, %cst_14 {dimension_numbers = #tpu.dot_dimension_numbers<[1], [0], [0], [1], [0, 0, 1, 1], [], []>} : vector<8x128xbf16>, vector<128x256xbf16>, vector<8x256xf32> -> vector<8x256xf32>
    %c0_15 = arith.constant 0 : index
    %c0_16 = arith.constant 0 : index
    %21 = vector.load %arg7[%c0_15, %c0_16] : memref<1x256xf32, #tpu.memory_space<vmem>>, vector<1x256xf32>
    %22 = vector.broadcast %21 : vector<1x256xf32> to vector<8x256xf32>
    %23 = arith.addf %20, %22 : vector<8x256xf32>
    %cst_17 = arith.constant 0.00999999977 : f32
    %24 = vector.broadcast %cst_17 : f32 to vector<8x256xf32>
    %25 = arith.mulf %24, %23 : vector<8x256xf32>
    %26 = arith.maximumf %23, %25 : vector<8x256xf32>
    %27 = arith.truncf %26 : vector<8x256xf32> to vector<8x256xbf16>
    %c0_18 = arith.constant 0 : index
    %c0_19 = arith.constant 0 : index
    %28 = vector.load %arg8[%c0_18, %c0_19] : memref<256x8xbf16, #tpu.memory_space<vmem>>, vector<256x8xbf16>
    %cst_20 = arith.constant dense<0.000000e+00> : vector<8x8xf32>
    %29 = tpu.matmul %27, %28, %cst_20 {dimension_numbers = #tpu.dot_dimension_numbers<[1], [0], [0], [1], [0, 0, 1, 1], [], []>} : vector<8x256xbf16>, vector<256x8xbf16>, vector<8x8xf32> -> vector<8x8xf32>
    %c0_21 = arith.constant 0 : index
    %c0_22 = arith.constant 0 : index
    %30 = vector.load %arg9[%c0_21, %c0_22] : memref<1x8xf32, #tpu.memory_space<vmem>>, vector<1x8xf32>
    %31 = vector.broadcast %30 : vector<1x8xf32> to vector<8x8xf32>
    %32 = arith.addf %29, %31 : vector<8x8xf32>
    %c0_23 = arith.constant 0 : index
    %c0_24 = arith.constant 0 : index
    %33 = vector.load %arg10[%c0_23, %c0_24] : memref<8x8xf32, #tpu.memory_space<vmem>>, vector<8x8xf32>
    tpu.vector_store %arg10[%c0_23, %c0_24], %32 {strides = array<i32>} : memref<8x8xf32, #tpu.memory_space<vmem>>, vector<8x8xf32>,
    return
  }
  func.func @transform_0(%arg0: i32) -> (i32, i32) {
    %c0_i32 = arith.constant 0 : i32
    %c0_i32_0 = arith.constant 0 : i32
    return %arg0, %c0_i32 : i32, i32
  }
  func.func @transform_1(%arg0: i32) -> (i32, i32) {
    %c0_i32 = arith.constant 0 : i32
    %c0_i32_0 = arith.constant 0 : i32
    %c0_i32_1 = arith.constant 0 : i32
    return %c0_i32, %c0_i32_0 : i32, i32
  }
  func.func @transform_2(%arg0: i32) -> (i32, i32) {
    %c0_i32 = arith.constant 0 : i32
    %c0_i32_0 = arith.constant 0 : i32
    %c0_i32_1 = arith.constant 0 : i32
    return %c0_i32, %c0_i32_0 : i32, i32
  }
  func.func @transform_3(%arg0: i32) -> (i32, i32) {
    %c0_i32 = arith.constant 0 : i32
    %c0_i32_0 = arith.constant 0 : i32
    %c0_i32_1 = arith.constant 0 : i32
    return %c0_i32, %c0_i32_0 : i32, i32
  }
  func.func @transform_4(%arg0: i32) -> (i32, i32) {
    %c0_i32 = arith.constant 0 : i32
    %c0_i32_0 = arith.constant 0 : i32
    %c0_i32_1 = arith.constant 0 : i32
    return %c0_i32, %c0_i32_0 : i32, i32
  }
  func.func @transform_5(%arg0: i32) -> (i32, i32) {
    %c0_i32 = arith.constant 0 : i32
    %c0_i32_0 = arith.constant 0 : i32
    %c0_i32_1 = arith.constant 0 : i32
    return %c0_i32, %c0_i32_0 : i32, i32
  }
  func.func @transform_6(%arg0: i32) -> (i32, i32) {
    %c0_i32 = arith.constant 0 : i32
    %c0_i32_0 = arith.constant 0 : i32
    %c0_i32_1 = arith.constant 0 : i32
    return %c0_i32, %c0_i32_0 : i32, i32
  }
  func.func @transform_7(%arg0: i32) -> (i32, i32) {
    %c0_i32 = arith.constant 0 : i32
    %c0_i32_0 = arith.constant 0 : i32
    %c0_i32_1 = arith.constant 0 : i32
    return %c0_i32, %c0_i32_0 : i32, i32
  }
  func.func @transform_8(%arg0: i32) -> (i32, i32) {
    %c0_i32 = arith.constant 0 : i32
    %c0_i32_0 = arith.constant 0 : i32
    %c0_i32_1 = arith.constant 0 : i32
    return %c0_i32, %c0_i32_0 : i32, i32
  }
  func.func @transform_9(%arg0: i32) -> (i32, i32) {
    %c0_i32 = arith.constant 0 : i32
    %c0_i32_0 = arith.constant 0 : i32
    return %arg0, %c0_i32 : i32, i32
  }
}

</mosaic_0001>

<bundles_post_ra>
// kernel: tpu_custom_call.1
= control target key start
LH: loop header
LB: loop body
LE: loop exit
PB: predicated region body
PF: predicated region fallthrough
CT: control target
= control target key end

     0   :  { %14 = vsyncpa [#allocation3], 0  ;;  %s981_s0 = inlined_call_operand.vmem [shape: f32[8,32], index: 0, kind: input, shape index: {}]   ;;  %s982_s1 = inlined_call_operand.hbm [shape: f32[32,64], index: 1, kind: input, shape index: {}]   ;;  %s983_s2 = inlined_call_operand.vmem [shape: f32[1,64], index: 2, kind: input, shape index: {}]   ;;  %s984_s3 = inlined_call_operand.hbm [shape: bf16[64,128], index: 3, kind: input, shape index: {}]   ;;  %s985_s4 = inlined_call_operand.vmem [shape: f32[1,128], index: 4, kind: input, shape index: {}]   ;;  %s986_s5 = inlined_call_operand.vmem [shape: bf16[128,256], index: 5, kind: input, shape index: {}]   ;;  %s987_s6 = inlined_call_operand.vmem [shape: f32[1,256], index: 6, kind: input, shape index: {}]   ;;  %s988_s7 = inlined_call_operand.vmem [shape: bf16[256,8], index: 7, kind: input, shape index: {}]   ;;  %s989_s8 = inlined_call_operand.vmem [shape: f32[1,8], index: 8, kind: input, shape index: {}]   ;;  %s990_s9 = inlined_call_operand.hbm [shape: f32[8,8], index: 9, kind: output, shape index: {}]  }
   0x1   :  { %15 = vsyncpa [#allocation6], 0 }
   0x2   :  { %16 = vsyncpa [#allocation4], 0  ;;  %s801_s30 = smov [#allocation2]  }
   0x3   :  { %s24_s10 = sshll.u32 %s801_s30, 4  ;;  %s25_s10 = int_to_ptr.vmem [resolvable:$true] %s24_s10 }
   0x4   :  { %s743_s11 = scalar_lea.vmem %s25_s10, 512  ;;  %p748_p1 = scmp.lt.s32.totalorder %s25_s10, %s25_s10 }
   0x5   :  { %p744_p0 = scmp.ne.s32.totalorder %s25_s10, %s743_s11  ;;  %p749_p2 = scmp.lt.s32.totalorder %s743_s11, %s743_s11 }
   0x7   :  { %p750_p3 = por %p749_p2, %p748_p1 }
   0x9   :  { %p751_p4 = pnand %p750_p3, %p744_p0 }
   0xb   :  { %754 = shalt.err (!%p751_p4)
}
   0xc   :  { %s802_s12 = smov 128   ;;  %s803_s13 = smov 8  }
   0xd   :  { %30 = dma.hbm_to_vmem [thread:$0]  %s982_s1, 512, %s25_s10, [#allocation3], %s802_s12, %s802_s12, %s803_s13  }
   0xe   :  { %s804_s16 = smov [#allocation5]  }
   0xf   :  { %s38_s17 = sshll.u32 %s804_s16, 4  ;;  %s39_s17 = int_to_ptr.vmem [resolvable:$true] %s38_s17 }
  0x10   :  { %s763_s18 = scalar_lea.vmem %s39_s17, 512  ;;  %p768_p6 = scmp.lt.s32.totalorder %s39_s17, %s39_s17 }
  0x11   :  { %p764_p5 = scmp.ne.s32.totalorder %s39_s17, %s763_s18  ;;  %p769_p7 = scmp.lt.s32.totalorder %s763_s18, %s763_s18 }
  0x13   :  { %p770_p8 = por %p769_p7, %p768_p6 }
  0x15   :  { %p771_p9 = pnand %p770_p8, %p764_p5 }
  0x17   :  { %774 = shalt.err (!%p771_p9)
}
  0x18   :  { %s805_s19 = smov 64   ;;  %s806_s20 = smov 4  }
  0x19   :  { %44 = dma.hbm_to_vmem [thread:$0]  %s984_s3, 512, %s39_s17, [#allocation6], %s805_s19, %s805_s19, %s806_s20  }
  0x1a   :  { %795 = dma.done.wait [#allocation3], 512  }
  0x1b   :  { %796 = vsyncadd [#allocation3], 4294966784 }
  0x1c   :  { %797 = dma.done.wait [#allocation6], 512  }
  0x1d   :  { %798 = vsyncadd [#allocation6], 4294966784  ;;  %v807_v0 = vmov 0.0   ;;  %vm808_vm0 = vmmov 0   ;;  %v66_v1 = vld [vmem:[#allocation2 + $0x18] sm:$0xff]  ;;  %v65_v2 = vld [vmem:[#allocation2 + $0x10] sm:$0xff]  ;;  %v255_v59 = vlaneseq }
  0x1e   :  { %658 = vmatprep.subr.mxu0 %v807_v0  ;;  %666 = vmatprep.mubr.msk.f32.mxu0 %vm808_vm0, %v807_v0  ;;  %v64_v3 = vld [vmem:[#allocation2 + $0x8] sm:$0xff]  ;;  %v63_v4 = vld [vmem:[#allocation2] sm:$0xff]  ;;  %v691_v5 = vld [vmem:[#allocation5 + $0x18] sm:$0xff]   ;;  %vm74_vm1 = vcmask 261120   ;;  %vm190_vm2 = vcmask 523264   ;;  %v809_v33 = vmov 0  }
  0x1f   :  { %669 = vmatprep.subr.bf16.mxu1 %v807_v0  ;;  %677 = vmatprep.mubr.msk.bf16.mxu1 %vm808_vm0, %v807_v0  ;;  %v62_v6 = vld [vmem:[%s981_s0] sm:$0xff]  ;;  %v692_v7 = vld [vmem:[#allocation5 + $0x10] sm:$0xff]   ;;  %v693_v8 = vld [vmem:[#allocation5 + $0x8] sm:$0xff]   ;;  %v256_v60 = vshrl.u32 %v255_v59, 7  ;;  %s810_s18 = smov [#allocation7]   ;;  %vm567_vm3 = vcmask 64512  }
  0x20   :  { %659 = vmatpush3.msra.mxu0 %v66_v1  ;;  %670 = vmatpush3.bf16.msra.mxu1 %v691_v5  ;;  %v694_v9 = vld [vmem:[#allocation5] sm:$0xff]   ;;  %v695_v10 = vld [vmem:[%s986_s5 + $0x70] ss:$8 sps:$4 sm:$0xff]   ;;  %v697_v11 = vld [vmem:[%s986_s5 + $0x74] ss:$8 sps:$4 sm:$0xff]   ;;  %s575_s19 = sshll.u32 %s810_s18, 4  ;;  %s576_s19 = int_to_ptr.vmem [resolvable:$true] %s575_s19 }
  0x21   :  { %660 = vmatprep.subr.mxu0 %v807_v0  ;;  %671 = vmatprep.subr.bf16.mxu1 %v807_v0  ;;  %v700_v12 = vld [vmem:[%s986_s5 + $0x64] ss:$8 sps:$4 sm:$0xff]   ;;  %v698_v13 = vld [vmem:[%s986_s5 + $0x60] ss:$8 sps:$4 sm:$0xff]   ;;  %v703_v14 = vld [vmem:[%s986_s5 + $0x54] ss:$8 sps:$4 sm:$0xff]   ;;  %p780_p11 = scmp.lt.s32.totalorder %s576_s19, %s576_s19 }
  0x22   :  { %661 = vmatpush3.msra.mxu0 %v65_v2  ;;  %v701_v15 = vld [vmem:[%s986_s5 + $0x50] ss:$8 sps:$4 sm:$0xff]   ;;  %v706_v16 = vld [vmem:[%s986_s5 + $0x44] ss:$8 sps:$4 sm:$0xff]   ;;  %v704_v17 = vld [vmem:[%s986_s5 + $0x40] ss:$8 sps:$4 sm:$0xff]  }
  0x23   :  { %662 = vmatprep.subr.mxu0 %v807_v0  ;;  %v709_v18 = vld [vmem:[%s986_s5 + $0x34] ss:$8 sps:$4 sm:$0xff]   ;;  %v707_v19 = vld [vmem:[%s986_s5 + $0x30] ss:$8 sps:$4 sm:$0xff]   ;;  %v712_v20 = vld [vmem:[%s986_s5 + $0x24] ss:$8 sps:$4 sm:$0xff]  }
  0x24   :  { %663 = vmatpush3.msra.mxu0 %v64_v3  ;;  %672 = vmatpush3.bf16.msra.mxu1 %v692_v7  ;;  %v710_v21 = vld [vmem:[%s986_s5 + $0x20] ss:$8 sps:$4 sm:$0xff]   ;;  %v715_v29 = vld [vmem:[%s986_s5 + $0x14] ss:$8 sps:$4 sm:$0xff]   ;;  %v713_v30 = vld [vmem:[%s986_s5 + $0x10] ss:$8 sps:$4 sm:$0xff]  }
  0x25   :  { %664 = vmatprep.subr.mxu0 %v807_v0  ;;  %673 = vmatprep.subr.bf16.mxu1 %v807_v0  ;;  %v585_v22 = vld [vmem:[%s983_s2] ss:$0 sm:$0xff]  ;;  %v718_v31 = vld [vmem:[%s986_s5 + $0x4] ss:$8 sps:$4 sm:$0xff]   ;;  %v719_v34 = vld [vmem:[%s988_s7 + $0x78] sm:$0xff]   ;;  %v257_v61 = vsub.s32 0, %v256_v60 }
  0x26   :  { %665 = vmatpush3.msra.mxu0 %v63_v4  ;;  %v716_v32 = vld [vmem:[%s986_s5] ss:$8 sps:$4 sm:$0xff]   ;;  %v720_v35 = vld [vmem:[%s988_s7 + $0x38] sm:$0xff]   ;;  %v721_v36 = vld [vmem:[%s988_s7 + $0x70] sm:$0xff]   ;;  %v261_v63 = vsub.s32 1, %v256_v60  ;;  %s775_s20 = scalar_lea.vmem %s576_s19, 128 }
  0x27   :  { %667 = vmatmul.mubr.msk.f32.vlgmr.msra.gmra.mxu0 %vm74_vm1, %v62_v6  ;;  %345 = vmatprep.subr.bf16.mxu0 %v697_v11  ;;  %v722_v37 = vld [vmem:[%s988_s7 + $0x30] sm:$0xff]   ;;  %v723_v38 = vld [vmem:[%s988_s7 + $0x68] sm:$0xff]   ;;  %v725_v40 = vld [vmem:[%s988_s7 + $0x60] sm:$0xff]   ;;  %p776_p10 = scmp.ne.s32.totalorder %s576_s19, %s775_s20  ;;  %p781_p12 = scmp.lt.s32.totalorder %s775_s20, %s775_s20 }
  0x28   :  { %674 = vmatpush3.bf16.msra.mxu1 %v693_v8  ;;  %346 = vmatpush1.bf16.msra.mxu0 %v695_v10  ;;  %v724_v39 = vld [vmem:[%s988_s7 + $0x28] sm:$0xff]   ;;  %v726_v41 = vld [vmem:[%s988_s7 + $0x20] sm:$0xff]   ;;  %v727_v42 = vld [vmem:[%s988_s7 + $0x58] sm:$0xff]  }
  0x29   :  { %675 = vmatprep.subr.bf16.mxu1 %v807_v0  ;;  %347 = vmatprep.subr.bf16.mxu0 %v700_v12  ;;  %v728_v43 = vld [vmem:[%s988_s7 + $0x18] sm:$0xff]   ;;  %v587_v44 = vld [vmem:[%s985_s4] ss:$0 sm:$0xff]  ;;  %v729_v53 = vld [vmem:[%s988_s7 + $0x50] sm:$0xff]   ;;  %p782_p13 = por %p781_p12, %p780_p11 }
  0x2a   :  { %377 = vmatprep.mubr.bf16.mxu0 %v809_v33  ;;  %v730_v54 = vld [vmem:[%s988_s7 + $0x10] sm:$0xff]   ;;  %v731_v55 = vld [vmem:[%s988_s7 + $0x48] sm:$0xff]   ;;  %v733_v57 = vld [vmem:[%s988_s7 + $0x40] sm:$0xff]  }
  0x2b   :  { %v732_v56 = vld [vmem:[%s988_s7 + $0x8] sm:$0xff]   ;;  %v734_v58 = vld [vmem:[%s988_s7] sm:$0xff]   ;;  %p783_p0 = pnand %p782_p13, %p776_p10 }
  0x2c   :  { %676 = vmatpush3.bf16.msra.mxu1 %v694_v9  ;;  %348 = vmatpush1.bf16.msra.mxu0 %v698_v13  ;;  %v253_v62 = vld [vmem:[%s987_s6] sm:$0x3] }
  0x2d   :  { %349 = vmatprep.subr.bf16.mxu0 %v703_v14  ;;  %636 = vmatprep.subr.bf16.mxu1 %v719_v34  ;;  %v258_v0 = vrot.slane %v253_v62, %v257_v61  ;;  %v262_v1 = vrot.slane %v253_v62, %v261_v63 }
  0x30   :  { %350 = vmatpush1.bf16.msra.mxu0 %v701_v15  ;;  %v609_v15 = vld [vmem:[%s989_s8] ss:$0 sm:$0xff] }
  0x31   :  { %351 = vmatprep.subr.bf16.mxu0 %v706_v16 }
  0x34   :  { %352 = vmatpush1.bf16.msra.mxu0 %v704_v17 }
  0x35   :  { %353 = vmatprep.subr.bf16.mxu0 %v709_v18 }
  0x38   :  { %354 = vmatpush1.bf16.msra.mxu0 %v707_v19 }
  0x39   :  { %355 = vmatprep.subr.bf16.mxu0 %v712_v20 }
  0x3c   :  { %356 = vmatpush1.bf16.msra.mxu0 %v710_v21 }
  0x3d   :  { %357 = vmatprep.subr.bf16.mxu0 %v715_v29 }
  0x40   :  { %358 = vmatpush1.bf16.msra.mxu0 %v713_v30 }
  0x41   :  { %359 = vmatprep.subr.bf16.mxu0 %v718_v31 }
  0x44   :  { %360 = vmatpush1.bf16.msra.mxu0 %v716_v32 }
  0xe7   :  { %v144_v23 = vpop.f32.mrf.mxu0 }
  0xe8   :  { %v145_v24 = vadd.f32 %v585_v22, %v144_v23 }
  0xe9   :  { %v668_v25 = vpop.f32.mrf.mxu0 }
  0xea   :  { %v148_v26 = vmul.f32 0.01, %v145_v24 }
  0xec   :  { %v149_v27 = vmax.f32 %v145_v24, %v148_v26 }
  0xee   :  { %v150_v28 = vpack.c.bf16 %v149_v27, %v149_v27 }
  0xf0   :  { %678 = vmatmul.mubr.msk.bf16.vlgmr.msra.gmra.mxu1 %vm190_vm2, %v150_v28 }
  0xf1   :  { %637 = vmatpush3.bf16.msra.mxu1 %v720_v35 }
  0xf2   :  { %638 = vmatprep.subr.bf16.mxu1 %v721_v36 }
  0xf5   :  { %639 = vmatpush3.bf16.msra.mxu1 %v722_v37 }
  0xf6   :  { %640 = vmatprep.subr.bf16.mxu1 %v723_v38 }
  0xf9   :  { %641 = vmatpush3.bf16.msra.mxu1 %v724_v39 }
  0xfa   :  { %642 = vmatprep.subr.bf16.mxu1 %v725_v40 }
  0xfd   :  { %643 = vmatpush3.bf16.msra.mxu1 %v726_v41 }
  0xfe   :  { %644 = vmatprep.subr.bf16.mxu1 %v727_v42 }
 0x101   :  { %645 = vmatpush3.bf16.msra.mxu1 %v728_v43 }
 0x102   :  { %646 = vmatprep.subr.bf16.mxu1 %v729_v53 }
 0x105   :  { %647 = vmatpush3.bf16.msra.mxu1 %v730_v54 }
 0x106   :  { %648 = vmatprep.subr.bf16.mxu1 %v731_v55 }
 0x109   :  { %649 = vmatpush3.bf16.msra.mxu1 %v732_v56 }
 0x10a   :  { %650 = vmatprep.subr.bf16.mxu1 %v733_v57 }
 0x10d   :  { %651 = vmatpush3.bf16.msra.mxu1 %v734_v58 }
 0x1b0   :  { %v228_v45 = vpop.f32.mrf.mxu1 }
 0x1b1   :  { %v229_v46 = vadd.f32 %v587_v44, %v228_v45 }
 0x1b2   :  { %v679_v47 = vpop.f32.mrf.mxu1 }
 0x1b3   :  { %v234_v48 = vmul.f32 0.01, %v229_v46 }
 0x1b4   :  { %v231_v49 = vpop.f32.mrf.mxu1 }
 0x1b5   :  { %v235_v50 = vmax.f32 %v229_v46, %v234_v48 }
 0x1b6   :  { %v680_v51 = vpop.f32.mrf.mxu1 }
 0x1b7   :  { %v236_v52 = vpack.c.bf16 %v235_v50, %v235_v50 }
 0x1b9   :  { %378 = vmatmul.mubr.bf16.vlgmr.msra.gmra.mxu0 %v236_v52 }
 0x279   :  { %v379_v2 = vpop.f32.mrf.mxu0 }
 0x27a   :  { %v380_v3 = vadd.f32 %v379_v2, %v258_v0 }
 0x27b   :  { %v381_v4 = vpop.f32.mrf.mxu0 }
 0x27c   :  { %v386_v5 = vmul.f32 0.01, %v380_v3  ;;  %v382_v6 = vadd.f32 %v381_v4, %v262_v1 }
 0x27d   :  { %v383_v7 = vpop.f32.mrf.mxu0 }
 0x27e   :  { %v387_v8 = vmul.f32 0.01, %v382_v6  ;;  %v388_v9 = vmax.f32 %v380_v3, %v386_v5 }
 0x27f   :  { %v384_v10 = vpop.f32.mrf.mxu0 }
 0x280   :  { %v389_v11 = vmax.f32 %v382_v6, %v387_v8  ;;  %v390_v13 = vpack.c.bf16 %v388_v9, %v388_v9 }
 0x282   :  { %v391_v12 = vpack.c.bf16 %v389_v11, %v389_v11 }
 0x284   :  { %559 = vmatprep.mubr.bf16.mxu1 %v391_v12 }
 0x285   :  { %560 = vmatmul.mubr.bf16.vlgmr.msra.gmra.mxu1 %v390_v13 }
 0x345   :  { %v652_v14 = vpop.f32.mrf.mxu1 }
 0x347   :  { %v653_v16 = vpop.f32.mrf.mxu1 }
 0x348   :  { %v654_v17 = vadd.f32 %v653_v16, %v652_v14 }
 0x349   :  { %v655_v18 = vpop.f32.mrf.mxu1 }
 0x34a   :  { %v562_v19 = vadd.f32 %v654_v17, %v609_v15 }
 0x34b   :  { %v656_v20 = vpop.f32.mrf.mxu1 }
 0x34c   :  { %568 = vst.msk [vmem:[#allocation7] sm:$0xff] %vm567_vm3, %v562_v19 }
 0x34d   :  { %786 = shalt.err (!%p783_p0)
}
 0x34e   :  { %578 = dma.vmem_to_hbm [thread:$0]  %s576_s19, 128, %s990_s9, [#allocation4]  }
 0x34f   :  { %799 = dma.done.wait [#allocation4], 128  }
 0x350   :  { %800 = vsyncadd [#allocation4], 4294967168 }
 0x351   :  { %582 = vsyncpa [#allocation3], 1 }
 0x352   :  { %583 = vsyncpa [#allocation6], 1 }
 0x353   :  { %584 = vsyncpa [#allocation4], 1 }

</bundles_post_ra>
